<compile_context>
chip_gen: v7x
topology: tpu7x:2x2x1
jax: 0.10.0
libtpu: 0.0.40
codegen_flags: <defaults>
</compile_context>

<pallas_src>
import jax
import jax.numpy as jnp
from jax.experimental import pallas as pl
from jax.experimental.pallas import tpu as pltpu

LANE = 128   # lane width: pad every feature/class dim to a multiple of this
TM = 128     # node-row tile (sublane-major), multiple of 8 (and of 16 for bf16)


def _round_up(x, m):
    return (x + m - 1) // m * m


def _pad2(x, rows, cols):
    r, c = x.shape
    return jnp.pad(x, ((0, rows - r), (0, cols - c)))


def _compiler_params():
    return pltpu.CompilerParams(
        dimension_semantics=("parallel",),          # shard row tiles across TCs
        vmem_limit_bytes=64 * 1024 * 1024,          # explicit, not scoped default
    )


def _row_spec(tm, cols):
    return pl.BlockSpec((tm, cols), lambda i: (i, 0))


def _full_spec(rows, cols):
    return pl.BlockSpec((rows, cols), lambda i: (0, 0))


# ----------------------------- kernels --------------------------------------

def xform_kernel(h_ref, w_ref, out_ref):
    """Per row tile: Z_tile = H_tile @ W (bf16 MXU inputs, f32 acc, bf16 out)."""
    acc = jnp.dot(h_ref[...], w_ref[...], preferred_element_type=jnp.float32)
    out_ref[...] = acc.astype(out_ref.dtype)


def agg_relu_kernel(a_ref, z_ref, b_ref, out_ref):
    """Per row tile: H_tile = relu(A_tile @ Z + b); epilogue in f32, bf16 out."""
    acc = jnp.dot(a_ref[...], z_ref[...], preferred_element_type=jnp.float32)
    acc = jnp.maximum(acc + b_ref[...], 0.0)
    out_ref[...] = acc.astype(out_ref.dtype)


def head_kernel(a_ref, z3_ref, b3_ref, x_ref, wr_ref, br_ref, wo_ref, bo_ref,
                out_ref):
    """conv3 aggregation + residual Linear + relu + output Linear, per row tile."""
    h3 = jnp.dot(a_ref[...], z3_ref[...],
                 preferred_element_type=jnp.float32) + b3_ref[...]
    res = jnp.dot(x_ref[...], wr_ref[...],
                  preferred_element_type=jnp.float32) + br_ref[...]
    h = jnp.maximum(h3 + res, 0.0)                         # residual + relu in f32
    out_ref[...] = (jnp.dot(h.astype(jnp.bfloat16), wo_ref[...],
                            preferred_element_type=jnp.float32) + bo_ref[...])


# --------------------------- pallas_call wrappers ----------------------------

def feature_transform(h, w):
    n, fin = h.shape
    fout = w.shape[1]
    cost = pl.CostEstimate(
        flops=2 * n * fin * fout, transcendentals=0,
        bytes_accessed=2 * (n * fin + fin * fout + n * fout))
    return pl.pallas_call(
        xform_kernel,
        out_shape=jax.ShapeDtypeStruct((n, fout), jnp.bfloat16),
        grid=(n // TM,),
        in_specs=[_row_spec(TM, fin), _full_spec(fin, fout)],
        out_specs=_row_spec(TM, fout),
        compiler_params=_compiler_params(),
        cost_estimate=cost,
    )(h, w)


def gcn_aggregate_relu(a, z, b):
    n = a.shape[0]
    fout = z.shape[1]
    cost = pl.CostEstimate(
        flops=2 * n * n * fout, transcendentals=0,
        bytes_accessed=2 * n * n + 4 * n * fout + 4 * fout)
    return pl.pallas_call(
        agg_relu_kernel,
        out_shape=jax.ShapeDtypeStruct((n, fout), jnp.bfloat16),
        grid=(n // TM,),
        in_specs=[_row_spec(TM, n),          # A_hat row tile (pipelined DMA)
                  _full_spec(n, fout),       # Z resident
                  _full_spec(1, fout)],      # bias (f32)
        out_specs=_row_spec(TM, fout),
        compiler_params=_compiler_params(),
        cost_estimate=cost,
    )(a, z, b)


def gcn_head(a, z3, b3, x, wr, br, wo, bo):
    n = a.shape[0]
    h3p = z3.shape[1]
    ifp = x.shape[1]
    cp = wo.shape[1]
    flops = 2 * n * n * h3p + 2 * n * ifp * h3p + 2 * n * h3p * cp
    cost = pl.CostEstimate(
        flops=flops, transcendentals=0,
        bytes_accessed=2 * n * n + 2 * n * h3p + 2 * n * ifp + 4 * n * cp)
    return pl.pallas_call(
        head_kernel,
        out_shape=jax.ShapeDtypeStruct((n, cp), jnp.float32),
        grid=(n // TM,),
        in_specs=[_row_spec(TM, n),          # A_hat row tile
                  _full_spec(n, h3p),        # Z3 = H2 @ W3 resident
                  _full_spec(1, h3p),        # b3
                  _row_spec(TM, ifp),        # X row tile (residual branch)
                  _full_spec(ifp, h3p),      # Wr
                  _full_spec(1, h3p),        # br
                  _full_spec(h3p, cp),       # Wo
                  _full_spec(1, cp)],        # bo
        out_specs=_row_spec(TM, cp),         # lane-dense (padded-to-128) output
        compiler_params=_compiler_params(),
        cost_estimate=cost,
    )(a, z3, b3, x, wr, br, wo, bo)


# ------------------------------ forward --------------------------------------

def gcn_3_layer_edge_weight_fc_forward(a_hat, x, params):
    n, in_feats = x.shape
    num_classes = params["wo"].shape[1]

    np_ = _round_up(max(n, TM), TM)            # node dim padded: multiple of 128
    ifp = _round_up(in_feats, LANE)
    h1p = _round_up(params["w1"].shape[1], LANE)
    h2p = _round_up(params["w2"].shape[1], LANE)
    h3p = _round_up(params["w3"].shape[1], LANE)
    cp = _round_up(num_classes, LANE)

    bf = jnp.bfloat16
    # Zero-padding is exact: padded nodes have zero rows/cols in A_hat and
    # padded feature columns multiply zero weight rows, so real outputs are
    # unchanged; padded rows/cols are sliced off at the end.
    a_p = _pad2(a_hat, np_, np_).astype(bf)
    x_p = _pad2(x, np_, ifp).astype(bf)

    w1 = _pad2(params["w1"], ifp, h1p).astype(bf)
    b1 = _pad2(params["b1"], 1, h1p).astype(jnp.float32)
    w2 = _pad2(params["w2"], h1p, h2p).astype(bf)
    b2 = _pad2(params["b2"], 1, h2p).astype(jnp.float32)
    w3 = _pad2(params["w3"], h2p, h3p).astype(bf)
    b3 = _pad2(params["b3"], 1, h3p).astype(jnp.float32)
    wr = _pad2(params["wr"], ifp, h3p).astype(bf)
    br = _pad2(params["br"], 1, h3p).astype(jnp.float32)
    wo = _pad2(params["wo"], h3p, cp).astype(bf)
    bo = _pad2(params["bo"], 1, cp).astype(jnp.float32)

    # conv1: relu(A @ (X @ W1) + b1)
    z1 = feature_transform(x_p, w1)
    h1 = gcn_aggregate_relu(a_p, z1, b1)
    # conv2: relu(A @ (H1 @ W2) + b2)
    z2 = feature_transform(h1, w2)
    h2 = gcn_aggregate_relu(a_p, z2, b2)
    # conv3 + residual + relu + output Linear, fused per row tile
    z3 = feature_transform(h2, w3)
    out_p = gcn_head(a_p, z3, b3, x_p, wr, br, wo, bo)

    return out_p[:n, :num_classes]


# ------------------------------ test harness ---------------------------------

def make_params(key, in_feats, h1, h2, h3, num_classes):
    ks = jax.random.split(key, 10)
    s = 0.1
    return {
        # torch nn.Linear weights are (out, in); stored transposed (in, out).
        "wr": s * jax.random.normal(ks[0], (in_feats, h3), jnp.float32),
        "br": s * jax.random.normal(ks[1], (1, h3), jnp.float32),
        "w1": s * jax.random.normal(ks[2], (in_feats, h1), jnp.float32),
        "b1": s * jax.random.normal(ks[3], (1, h1), jnp.float32),
        "w2": s * jax.random.normal(ks[4], (h1, h2), jnp.float32),
        "b2": s * jax.random.normal(ks[5], (1, h2), jnp.float32),
        "w3": s * jax.random.normal(ks[6], (h2, h3), jnp.float32),
        "b3": s * jax.random.normal(ks[7], (1, h3), jnp.float32),
        "wo": s * jax.random.normal(ks[8], (h3, num_classes), jnp.float32),
        "bo": s * jax.random.normal(ks[9], (1, num_classes), jnp.float32),
    }


def make_normalized_weighted_adjacency(k_graph, k_weight, n):
    """Dense edge-weighted adjacency with self-loops, symmetric normalization
    by the weighted degree (matches GraphConvEdgeWeight / norm='both')."""
    mask = (jax.random.uniform(k_graph, (n, n)) < 0.4).astype(jnp.float32)
    mask = jnp.maximum(mask, mask.T)
    ew = jax.random.uniform(k_weight, (n, n), minval=0.5, maxval=1.5)
    ew = 0.5 * (ew + ew.T)
    a = mask * ew
    a = a * (1.0 - jnp.eye(n, dtype=jnp.float32)) + jnp.eye(n, dtype=jnp.float32)
    deg = jnp.maximum(a.sum(axis=1), 1e-6)
    d_inv_sqrt = 1.0 / jnp.sqrt(deg)
    return a * d_inv_sqrt[:, None] * d_inv_sqrt[None, :]


def reference_forward(a_hat, x, p):
    res = x @ p["wr"] + p["br"]
    h = jnp.maximum(a_hat @ (x @ p["w1"]) + p["b1"], 0.0)
    h = jnp.maximum(a_hat @ (h @ p["w2"]) + p["b2"], 0.0)
    h = a_hat @ (h @ p["w3"]) + p["b3"]
    h = jnp.maximum(h + res, 0.0)
    return h @ p["wo"] + p["bo"]


if __name__ == "__main__":
    # Small shapes consistent with the module.
    N, IN_FEATS, H1, H2, H3, NUM_CLASSES = 12, 16, 32, 32, 32, 8

    key = jax.random.PRNGKey(0)
    k_graph, k_weight, k_x, k_params = jax.random.split(key, 4)

    a_hat = make_normalized_weighted_adjacency(k_graph, k_weight, N)
    x = jax.random.normal(k_x, (N, IN_FEATS), jnp.float32)
    params = make_params(k_params, IN_FEATS, H1, H2, H3, NUM_CLASSES)

    fwd = jax.jit(gcn_3_layer_edge_weight_fc_forward)
    out = fwd(a_hat, x, params)
    out = jax.block_until_ready(out)

    ref = reference_forward(a_hat, x, params)
    assert out.shape == (N, NUM_CLASSES)
    # bf16 MXU inputs (f32 accumulation) -> ~1e-2 level error vs. the f32 reference.
    err = float(jnp.max(jnp.abs(out - ref)))
    assert jnp.allclose(out, ref, atol=5e-2, rtol=5e-2), err

    print("KERNEL_OK")
</pallas_src>

<mosaic_0001>
module attributes {stable_mosaic.version = 11 : i64} {
  func.func @xform_kernel(%arg0: i32, %arg1: memref<128x128xbf16, #tpu.memory_space<vmem>>, %arg2: memref<128x128xbf16, #tpu.memory_space<vmem>>, %arg3: memref<128x128xbf16, #tpu.memory_space<vmem>>) attributes {dimension_semantics = [#tpu.dimension_semantics<parallel>], iteration_bounds = array<i64: 1>, scalar_prefetch = 0 : i64, scratch_operands = 0 : i64, tpu.core_type = #tpu.core_type<tc>, window_params = [{transform_indices = @transform_0, window_bounds = array<i64: 128, 128>}, {pipeline_mode = #tpu.pipeline_mode<synchronous>, transform_indices = @transform_1, window_bounds = array<i64: 128, 128>}, {transform_indices = @transform_2, window_bounds = array<i64: 128, 128>}]} {
    %c0 = arith.constant 0 : index
    %c0_0 = arith.constant 0 : index
    %0 = vector.load %arg1[%c0, %c0_0] : memref<128x128xbf16, #tpu.memory_space<vmem>>, vector<128x128xbf16>
    %c0_1 = arith.constant 0 : index
    %c0_2 = arith.constant 0 : index
    %1 = vector.load %arg2[%c0_1, %c0_2] : memref<128x128xbf16, #tpu.memory_space<vmem>>, vector<128x128xbf16>
    %cst = arith.constant dense<0.000000e+00> : vector<128x128xf32>
    %2 = tpu.matmul %0, %1, %cst {dimension_numbers = #tpu.dot_dimension_numbers<[1], [0], [0], [1], [0, 0, 1, 1], [], []>} : vector<128x128xbf16>, vector<128x128xbf16>, vector<128x128xf32> -> vector<128x128xf32>
    %3 = arith.truncf %2 : vector<128x128xf32> to vector<128x128xbf16>
    %c0_3 = arith.constant 0 : index
    %c0_4 = arith.constant 0 : index
    %4 = vector.load %arg3[%c0_3, %c0_4] : memref<128x128xbf16, #tpu.memory_space<vmem>>, vector<128x128xbf16>
    tpu.vector_store %arg3[%c0_3, %c0_4], %3 {strides = array<i32>} : memref<128x128xbf16, #tpu.memory_space<vmem>>, vector<128x128xbf16>,
    return
  }
  func.func @transform_0(%arg0: i32) -> (i32, i32) {
    %c0_i32 = arith.constant 0 : i32
    %c0_i32_0 = arith.constant 0 : i32
    return %arg0, %c0_i32 : i32, i32
  }
  func.func @transform_1(%arg0: i32) -> (i32, i32) {
    %c0_i32 = arith.constant 0 : i32
    %c0_i32_0 = arith.constant 0 : i32
    %c0_i32_1 = arith.constant 0 : i32
    return %c0_i32, %c0_i32_0 : i32, i32
  }
  func.func @transform_2(%arg0: i32) -> (i32, i32) {
    %c0_i32 = arith.constant 0 : i32
    %c0_i32_0 = arith.constant 0 : i32
    return %arg0, %c0_i32 : i32, i32
  }
}

module attributes {stable_mosaic.version = 11 : i64} {
  func.func @agg_relu_kernel(%arg0: i32, %arg1: memref<128x128xbf16, #tpu.memory_space<vmem>>, %arg2: memref<128x128xbf16, #tpu.memory_space<vmem>>, %arg3: memref<1x128xf32, #tpu.memory_space<vmem>>, %arg4: memref<128x128xbf16, #tpu.memory_space<vmem>>) attributes {dimension_semantics = [#tpu.dimension_semantics<parallel>], iteration_bounds = array<i64: 1>, scalar_prefetch = 0 : i64, scratch_operands = 0 : i64, tpu.core_type = #tpu.core_type<tc>, window_params = [{transform_indices = @transform_0, window_bounds = array<i64: 128, 128>}, {pipeline_mode = #tpu.pipeline_mode<synchronous>, transform_indices = @transform_1, window_bounds = array<i64: 128, 128>}, {pipeline_mode = #tpu.pipeline_mode<synchronous>, transform_indices = @transform_2, window_bounds = array<i64: 1, 128>}, {transform_indices = @transform_3, window_bounds = array<i64: 128, 128>}]} {
    %c0 = arith.constant 0 : index
    %c0_0 = arith.constant 0 : index
    %0 = vector.load %arg1[%c0, %c0_0] : memref<128x128xbf16, #tpu.memory_space<vmem>>, vector<128x128xbf16>
    %c0_1 = arith.constant 0 : index
    %c0_2 = arith.constant 0 : index
    %1 = vector.load %arg2[%c0_1, %c0_2] : memref<128x128xbf16, #tpu.memory_space<vmem>>, vector<128x128xbf16>
    %cst = arith.constant dense<0.000000e+00> : vector<128x128xf32>
    %2 = tpu.matmul %0, %1, %cst {dimension_numbers = #tpu.dot_dimension_numbers<[1], [0], [0], [1], [0, 0, 1, 1], [], []>} : vector<128x128xbf16>, vector<128x128xbf16>, vector<128x128xf32> -> vector<128x128xf32>
    %c0_3 = arith.constant 0 : index
    %c0_4 = arith.constant 0 : index
    %3 = vector.load %arg3[%c0_3, %c0_4] : memref<1x128xf32, #tpu.memory_space<vmem>>, vector<1x128xf32>
    %4 = vector.broadcast %3 : vector<1x128xf32> to vector<128x128xf32>
    %5 = arith.addf %2, %4 : vector<128x128xf32>
    %cst_5 = arith.constant 0.000000e+00 : f32
    %6 = vector.broadcast %cst_5 : f32 to vector<128x128xf32>
    %7 = arith.maximumf %5, %6 : vector<128x128xf32>
    %8 = arith.truncf %7 : vector<128x128xf32> to vector<128x128xbf16>
    %c0_6 = arith.constant 0 : index
    %c0_7 = arith.constant 0 : index
    %9 = vector.load %arg4[%c0_6, %c0_7] : memref<128x128xbf16, #tpu.memory_space<vmem>>, vector<128x128xbf16>
    tpu.vector_store %arg4[%c0_6, %c0_7], %8 {strides = array<i32>} : memref<128x128xbf16, #tpu.memory_space<vmem>>, vector<128x128xbf16>,
    return
  }
  func.func @transform_0(%arg0: i32) -> (i32, i32) {
    %c0_i32 = arith.constant 0 : i32
    %c0_i32_0 = arith.constant 0 : i32
    return %arg0, %c0_i32 : i32, i32
  }
  func.func @transform_1(%arg0: i32) -> (i32, i32) {
    %c0_i32 = arith.constant 0 : i32
    %c0_i32_0 = arith.constant 0 : i32
    %c0_i32_1 = arith.constant 0 : i32
    return %c0_i32, %c0_i32_0 : i32, i32
  }
  func.func @transform_2(%arg0: i32) -> (i32, i32) {
    %c0_i32 = arith.constant 0 : i32
    %c0_i32_0 = arith.constant 0 : i32
    %c0_i32_1 = arith.constant 0 : i32
    return %c0_i32, %c0_i32_0 : i32, i32
  }
  func.func @transform_3(%arg0: i32) -> (i32, i32) {
    %c0_i32 = arith.constant 0 : i32
    %c0_i32_0 = arith.constant 0 : i32
    return %arg0, %c0_i32 : i32, i32
  }
}

module attributes {stable_mosaic.version = 11 : i64} {
  func.func @head_kernel(%arg0: i32, %arg1: memref<128x128xbf16, #tpu.memory_space<vmem>>, %arg2: memref<128x128xbf16, #tpu.memory_space<vmem>>, %arg3: memref<1x128xf32, #tpu.memory_space<vmem>>, %arg4: memref<128x128xbf16, #tpu.memory_space<vmem>>, %arg5: memref<128x128xbf16, #tpu.memory_space<vmem>>, %arg6: memref<1x128xf32, #tpu.memory_space<vmem>>, %arg7: memref<128x128xbf16, #tpu.memory_space<vmem>>, %arg8: memref<1x128xf32, #tpu.memory_space<vmem>>, %arg9: memref<128x128xf32, #tpu.memory_space<vmem>>) attributes {dimension_semantics = [#tpu.dimension_semantics<parallel>], iteration_bounds = array<i64: 1>, scalar_prefetch = 0 : i64, scratch_operands = 0 : i64, tpu.core_type = #tpu.core_type<tc>, window_params = [{transform_indices = @transform_0, window_bounds = array<i64: 128, 128>}, {pipeline_mode = #tpu.pipeline_mode<synchronous>, transform_indices = @transform_1, window_bounds = array<i64: 128, 128>}, {pipeline_mode = #tpu.pipeline_mode<synchronous>, transform_indices = @transform_2, window_bounds = array<i64: 1, 128>}, {transform_indices = @transform_3, window_bounds = array<i64: 128, 128>}, {pipeline_mode = #tpu.pipeline_mode<synchronous>, transform_indices = @transform_4, window_bounds = array<i64: 128, 128>}, {pipeline_mode = #tpu.pipeline_mode<synchronous>, transform_indices = @transform_5, window_bounds = array<i64: 1, 128>}, {pipeline_mode = #tpu.pipeline_mode<synchronous>, transform_indices = @transform_6, window_bounds = array<i64: 128, 128>}, {pipeline_mode = #tpu.pipeline_mode<synchronous>, transform_indices = @transform_7, window_bounds = array<i64: 1, 128>}, {transform_indices = @transform_8, window_bounds = array<i64: 128, 128>}]} {
    %c0 = arith.constant 0 : index
    %c0_0 = arith.constant 0 : index
    %0 = vector.load %arg1[%c0, %c0_0] : memref<128x128xbf16, #tpu.memory_space<vmem>>, vector<128x128xbf16>
    %c0_1 = arith.constant 0 : index
    %c0_2 = arith.constant 0 : index
    %1 = vector.load %arg2[%c0_1, %c0_2] : memref<128x128xbf16, #tpu.memory_space<vmem>>, vector<128x128xbf16>
    %cst = arith.constant dense<0.000000e+00> : vector<128x128xf32>
    %2 = tpu.matmul %0, %1, %cst {dimension_numbers = #tpu.dot_dimension_numbers<[1], [0], [0], [1], [0, 0, 1, 1], [], []>} : vector<128x128xbf16>, vector<128x128xbf16>, vector<128x128xf32> -> vector<128x128xf32>
    %c0_3 = arith.constant 0 : index
    %c0_4 = arith.constant 0 : index
    %3 = vector.load %arg3[%c0_3, %c0_4] : memref<1x128xf32, #tpu.memory_space<vmem>>, vector<1x128xf32>
    %4 = vector.broadcast %3 : vector<1x128xf32> to vector<128x128xf32>
    %5 = arith.addf %2, %4 : vector<128x128xf32>
    %c0_5 = arith.constant 0 : index
    %c0_6 = arith.constant 0 : index
    %6 = vector.load %arg4[%c0_5, %c0_6] : memref<128x128xbf16, #tpu.memory_space<vmem>>, vector<128x128xbf16>
    %c0_7 = arith.constant 0 : index
    %c0_8 = arith.constant 0 : index
    %7 = vector.load %arg5[%c0_7, %c0_8] : memref<128x128xbf16, #tpu.memory_space<vmem>>, vector<128x128xbf16>
    %cst_9 = arith.constant dense<0.000000e+00> : vector<128x128xf32>
    %8 = tpu.matmul %6, %7, %cst_9 {dimension_numbers = #tpu.dot_dimension_numbers<[1], [0], [0], [1], [0, 0, 1, 1], [], []>} : vector<128x128xbf16>, vector<128x128xbf16>, vector<128x128xf32> -> vector<128x128xf32>
    %c0_10 = arith.constant 0 : index
    %c0_11 = arith.constant 0 : index
    %9 = vector.load %arg6[%c0_10, %c0_11] : memref<1x128xf32, #tpu.memory_space<vmem>>, vector<1x128xf32>
    %10 = vector.broadcast %9 : vector<1x128xf32> to vector<128x128xf32>
    %11 = arith.addf %8, %10 : vector<128x128xf32>
    %12 = arith.addf %5, %11 : vector<128x128xf32>
    %cst_12 = arith.constant 0.000000e+00 : f32
    %13 = vector.broadcast %cst_12 : f32 to vector<128x128xf32>
    %14 = arith.maximumf %12, %13 : vector<128x128xf32>
    %15 = arith.truncf %14 : vector<128x128xf32> to vector<128x128xbf16>
    %c0_13 = arith.constant 0 : index
    %c0_14 = arith.constant 0 : index
    %16 = vector.load %arg7[%c0_13, %c0_14] : memref<128x128xbf16, #tpu.memory_space<vmem>>, vector<128x128xbf16>
    %cst_15 = arith.constant dense<0.000000e+00> : vector<128x128xf32>
    %17 = tpu.matmul %15, %16, %cst_15 {dimension_numbers = #tpu.dot_dimension_numbers<[1], [0], [0], [1], [0, 0, 1, 1], [], []>} : vector<128x128xbf16>, vector<128x128xbf16>, vector<128x128xf32> -> vector<128x128xf32>
    %c0_16 = arith.constant 0 : index
    %c0_17 = arith.constant 0 : index
    %18 = vector.load %arg8[%c0_16, %c0_17] : memref<1x128xf32, #tpu.memory_space<vmem>>, vector<1x128xf32>
    %19 = vector.broadcast %18 : vector<1x128xf32> to vector<128x128xf32>
    %20 = arith.addf %17, %19 : vector<128x128xf32>
    %c0_18 = arith.constant 0 : index
    %c0_19 = arith.constant 0 : index
    %21 = vector.load %arg9[%c0_18, %c0_19] : memref<128x128xf32, #tpu.memory_space<vmem>>, vector<128x128xf32>
    tpu.vector_store %arg9[%c0_18, %c0_19], %20 {strides = array<i32>} : memref<128x128xf32, #tpu.memory_space<vmem>>, vector<128x128xf32>,
    return
  }
  func.func @transform_0(%arg0: i32) -> (i32, i32) {
    %c0_i32 = arith.constant 0 : i32
    %c0_i32_0 = arith.constant 0 : i32
    return %arg0, %c0_i32 : i32, i32
  }
  func.func @transform_1(%arg0: i32) -> (i32, i32) {
    %c0_i32 = arith.constant 0 : i32
    %c0_i32_0 = arith.constant 0 : i32
    %c0_i32_1 = arith.constant 0 : i32
    return %c0_i32, %c0_i32_0 : i32, i32
  }
  func.func @transform_2(%arg0: i32) -> (i32, i32) {
    %c0_i32 = arith.constant 0 : i32
    %c0_i32_0 = arith.constant 0 : i32
    %c0_i32_1 = arith.constant 0 : i32
    return %c0_i32, %c0_i32_0 : i32, i32
  }
  func.func @transform_3(%arg0: i32) -> (i32, i32) {
    %c0_i32 = arith.constant 0 : i32
    %c0_i32_0 = arith.constant 0 : i32
    return %arg0, %c0_i32 : i32, i32
  }
  func.func @transform_4(%arg0: i32) -> (i32, i32) {
    %c0_i32 = arith.constant 0 : i32
    %c0_i32_0 = arith.constant 0 : i32
    %c0_i32_1 = arith.constant 0 : i32
    return %c0_i32, %c0_i32_0 : i32, i32
  }
  func.func @transform_5(%arg0: i32) -> (i32, i32) {
    %c0_i32 = arith.constant 0 : i32
    %c0_i32_0 = arith.constant 0 : i32
    %c0_i32_1 = arith.constant 0 : i32
    return %c0_i32, %c0_i32_0 : i32, i32
  }
  func.func @transform_6(%arg0: i32) -> (i32, i32) {
    %c0_i32 = arith.constant 0 : i32
    %c0_i32_0 = arith.constant 0 : i32
    %c0_i32_1 = arith.constant 0 : i32
    return %c0_i32, %c0_i32_0 : i32, i32
  }
  func.func @transform_7(%arg0: i32) -> (i32, i32) {
    %c0_i32 = arith.constant 0 : i32
    %c0_i32_0 = arith.constant 0 : i32
    %c0_i32_1 = arith.constant 0 : i32
    return %c0_i32, %c0_i32_0 : i32, i32
  }
  func.func @transform_8(%arg0: i32) -> (i32, i32) {
    %c0_i32 = arith.constant 0 : i32
    %c0_i32_0 = arith.constant 0 : i32
    return %arg0, %c0_i32 : i32, i32
  }
}

</mosaic_0001>

<bundles_post_ra>
// kernel: gcn_3_layer_edge_weight_fc_forward.6
= control target key start
LH: loop header
LB: loop body
LE: loop exit
PB: predicated region body
PF: predicated region fallthrough
CT: control target
= control target key end

     0   :  { %7 = vsyncpa [#allocation3], 0  ;;  %s681_s0 = inlined_call_operand.hbm [shape: bf16[128,128], index: 0, kind: input, shape index: {}]   ;;  %s682_s1 = inlined_call_operand.hbm [shape: bf16[128,128], index: 1, kind: input, shape index: {}]   ;;  %s683_s2 = inlined_call_operand.hbm [shape: bf16[128,128], index: 2, kind: output, shape index: {}]  }
   0x1   :  { %8 = vsyncpa [#allocation6], 0 }
   0x2   :  { %9 = vsyncpa [#allocation4], 0  ;;  %s616_s9 = smov [#allocation2]   ;;  %s544_s13 = scalar_lea.hbm %s681_s0, 1024 }
   0x3   :  { %s15_s10 = sshll.u32 %s616_s9, 4  ;;  %p545_p0 = scmp.ne.s32.totalorder %s681_s0, %s544_s13  ;;  %s16_s10 = int_to_ptr.vmem [resolvable:$true] %s15_s10 }
   0x4   :  { %p548_p1 = scmp.lt.u32.totalorder %s544_s13, %s681_s0 }
   0x6   :  { %p550_p2 = pnand %p548_p1, %p545_p0 }
   0x8   :  { %553 = shalt.err (!%p550_p2)
}
   0x9   :  { %s554_s18 = scalar_lea.vmem %s16_s10, 1024  ;;  %p559_p4 = scmp.lt.s32.totalorder %s16_s10, %s16_s10 }
   0xa   :  { %p555_p3 = scmp.ne.s32.totalorder %s16_s10, %s554_s18  ;;  %p560_p5 = scmp.lt.s32.totalorder %s554_s18, %s554_s18 }
   0xc   :  { %p561_p6 = por %p560_p5, %p559_p4 }
   0xe   :  { %p562_p7 = pnand %p561_p6, %p555_p3 }
  0x10   :  { %565 = shalt.err (!%p562_p7)
}
  0x11   :  { %s617_s19 = smov 64   ;;  %s618_s20 = smov 4  }
  0x12   :  { %21 = dma.hbm_to_vmem [thread:$0]  %s681_s0, 1024, %s16_s10, [#allocation3], %s617_s19, %s617_s19, %s618_s20  }
  0x13   :  { %s619_s23 = smov [#allocation5]   ;;  %s566_s27 = scalar_lea.hbm %s682_s1, 1024 }
  0x14   :  { %s27_s24 = sshll.u32 %s619_s23, 4  ;;  %p567_p8 = scmp.ne.s32.totalorder %s682_s1, %s566_s27  ;;  %s28_s24 = int_to_ptr.vmem [resolvable:$true] %s27_s24 }
  0x15   :  { %p570_p9 = scmp.lt.u32.totalorder %s566_s27, %s682_s1 }
  0x17   :  { %p572_p10 = pnand %p570_p9, %p567_p8 }
  0x19   :  { %575 = shalt.err (!%p572_p10)
}
  0x1a   :  { %s576_s4 = scalar_lea.vmem %s28_s24, 1024  ;;  %p581_p12 = scmp.lt.s32.totalorder %s28_s24, %s28_s24 }
  0x1b   :  { %p577_p11 = scmp.ne.s32.totalorder %s28_s24, %s576_s4  ;;  %p582_p13 = scmp.lt.s32.totalorder %s576_s4, %s576_s4 }
  0x1d   :  { %p583_p0 = por %p582_p13, %p581_p12 }
  0x1f   :  { %p584_p1 = pnand %p583_p0, %p577_p11 }
  0x21   :  { %587 = shalt.err (!%p584_p1)
}
  0x22   :  { %33 = dma.hbm_to_vmem [thread:$0]  %s682_s1, 1024, %s28_s24, [#allocation6], %s617_s19, %s617_s19, %s618_s20  }
  0x23   :  { %610 = dma.done.wait [#allocation3], 1024  }
  0x24   :  { %611 = vsyncadd [#allocation3], 4294966272 }
  0x25   :  { %612 = dma.done.wait [#allocation6], 1024  }
  0x26   :  { %613 = vsyncadd [#allocation6], 4294966272  ;;  %v528_v0 = vld [vmem:[#allocation5] sm:$0xff]   ;;  %v529_v1 = vld [vmem:[#allocation5 + $0x8] sm:$0xff]   ;;  %s620_s1 = smov [#allocation7]  }
  0x27   :  { %475 = vmatprep.subr.bf16.mxu0 %v528_v0  ;;  %507 = vmatprep.subr.bf16.mxu1 %v528_v0  ;;  %v530_v2 = vld [vmem:[#allocation5 + $0x10] sm:$0xff]   ;;  %v531_v3 = vld [vmem:[#allocation5 + $0x18] sm:$0xff]   ;;  %v536_v4 = vld [vmem:[#allocation2] sm:$0xff]   ;;  %s351_s6 = sshll.u32 %s620_s1, 4  ;;  %s352_s6 = int_to_ptr.vmem [resolvable:$true] %s351_s6 }
  0x28   :  { %476 = vmatpush3.bf16.msra.mxu0 %v528_v0  ;;  %515 = vmatpush3.bf16.msra.mxu1 %v528_v0  ;;  %v537_v5 = vld [vmem:[#allocation2 + $0x20] sm:$0xff]   ;;  %v533_v7 = vld [vmem:[#allocation5 + $0x28] sm:$0xff]   ;;  %v534_v8 = vld [vmem:[#allocation5 + $0x30] sm:$0xff]   ;;  %s588_s7 = scalar_lea.vmem %s352_s6, 1024  ;;  %p593_p3 = scmp.lt.s32.totalorder %s352_s6, %s352_s6 }
  0x29   :  { %477 = vmatprep.subr.bf16.mxu0 %v529_v1  ;;  %508 = vmatprep.subr.bf16.mxu1 %v529_v1  ;;  %v532_v6 = vld [vmem:[#allocation5 + $0x20] sm:$0xff]   ;;  %v535_v9 = vld [vmem:[#allocation5 + $0x38] sm:$0xff]   ;;  %v538_v10 = vld [vmem:[#allocation2 + $0x8] sm:$0xff]   ;;  %p589_p2 = scmp.ne.s32.totalorder %s352_s6, %s588_s7  ;;  %p594_p4 = scmp.lt.s32.totalorder %s588_s7, %s588_s7 }
  0x2a   :  { %491 = vmatprep.mubr.bf16.mxu0 %v536_v4  ;;  %499 = vmatprep.mubr.bf16.mxu1 %v537_v5  ;;  %v539_v11 = vld [vmem:[#allocation2 + $0x28] sm:$0xff]   ;;  %v540_v12 = vld [vmem:[#allocation2 + $0x10] sm:$0xff]   ;;  %v542_v14 = vld [vmem:[#allocation2 + $0x18] sm:$0xff]  }
  0x2b   :  { %v541_v13 = vld [vmem:[#allocation2 + $0x30] sm:$0xff]   ;;  %v543_v15 = vld [vmem:[#allocation2 + $0x38] sm:$0xff]   ;;  %p595_p5 = por %p594_p4, %p593_p3 }
  0x2c   :  { %478 = vmatpush3.bf16.msra.mxu0 %v529_v1  ;;  %516 = vmatpush3.bf16.msra.mxu1 %v529_v1 }
  0x2d   :  { %479 = vmatprep.subr.bf16.mxu0 %v530_v2  ;;  %509 = vmatprep.subr.bf16.mxu1 %v530_v2  ;;  %p596_p6 = pnand %p595_p5, %p589_p2 }
  0x30   :  { %480 = vmatpush3.bf16.msra.mxu0 %v530_v2  ;;  %517 = vmatpush3.bf16.msra.mxu1 %v530_v2 }
  0x31   :  { %481 = vmatprep.subr.bf16.mxu0 %v531_v3  ;;  %510 = vmatprep.subr.bf16.mxu1 %v531_v3 }
  0x34   :  { %482 = vmatpush3.bf16.msra.mxu0 %v531_v3  ;;  %518 = vmatpush3.bf16.msra.mxu1 %v531_v3 }
  0x35   :  { %483 = vmatprep.subr.bf16.mxu0 %v532_v6  ;;  %511 = vmatprep.subr.bf16.mxu1 %v532_v6 }
  0x38   :  { %484 = vmatpush3.bf16.msra.mxu0 %v532_v6  ;;  %519 = vmatpush3.bf16.msra.mxu1 %v532_v6 }
  0x39   :  { %485 = vmatprep.subr.bf16.mxu0 %v533_v7  ;;  %512 = vmatprep.subr.bf16.mxu1 %v533_v7 }
  0x3c   :  { %486 = vmatpush3.bf16.msra.mxu0 %v533_v7  ;;  %520 = vmatpush3.bf16.msra.mxu1 %v533_v7 }
  0x3d   :  { %487 = vmatprep.subr.bf16.mxu0 %v534_v8  ;;  %513 = vmatprep.subr.bf16.mxu1 %v534_v8 }
  0x40   :  { %488 = vmatpush3.bf16.msra.mxu0 %v534_v8  ;;  %521 = vmatpush3.bf16.msra.mxu1 %v534_v8 }
  0x41   :  { %489 = vmatprep.subr.bf16.mxu0 %v535_v9  ;;  %514 = vmatprep.subr.bf16.mxu1 %v535_v9 }
  0x44   :  { %490 = vmatpush3.bf16.msra.mxu0 %v535_v9  ;;  %522 = vmatpush3.bf16.msra.mxu1 %v535_v9 }
  0x47   :  { %492 = vmatmul.mubr.bf16.vlgmr.msra.gmra.mrb[0].mxu0 %v538_v10  ;;  %500 = vmatmul.mubr.bf16.vlgmr.msra.gmra.mrb[0].mxu1 %v539_v11 }
  0x48   :  { %495 = vmatprep.mubr.bf16.mxu0 %v540_v12  ;;  %503 = vmatprep.mubr.bf16.mxu1 %v541_v13 }
  0x4f   :  { %496 = vmatmul.mubr.bf16.gmra.mrb[4].mxu0 %v542_v14  ;;  %504 = vmatmul.mubr.bf16.gmra.mrb[4].mxu1 %v543_v15 }
 0x11a   :  { %v493_v16 = vpop.f32.mrb[0].mxu0  ;;  %v501_v17 = vpop.f32.mrb[0].mxu1 }
 0x11b   :  { %v203_v18 = vpop.f32.mrb[1].mxu0  ;;  %v235_v19 = vpop.f32.mrb[1].mxu1 }
 0x11c   :  { %v494_v20 = vpop.f32.mrb[2].mxu0  ;;  %v502_v21 = vpop.f32.mrb[2].mxu1 }
 0x11d   :  { %v420_v22 = vpack.c.bf16 %v494_v20, %v493_v16  ;;  %v440_v23 = vpack.c.bf16 %v502_v21, %v501_v17  ;;  %v206_v24 = vpop.f32.mrb[3].mxu0  ;;  %v238_v25 = vpop.f32.mrb[3].mxu1 }
 0x11e   :  { %v415_v26 = vpack.c.bf16 %v206_v24, %v203_v18  ;;  %v435_v27 = vpack.c.bf16 %v238_v25, %v235_v19 }
 0x11f   :  { %452 = vst [vmem:[#allocation7 + $0x8] sm:$0xff] %v420_v22   ;;  %456 = vst [vmem:[#allocation7 + $0x28] sm:$0xff] %v440_v23  }
 0x120   :  { %416 = vst [vmem:[#allocation7] sm:$0xff] %v415_v26   ;;  %455 = vst [vmem:[#allocation7 + $0x20] sm:$0xff] %v435_v27  }
 0x122   :  { %v497_v28 = vpop.f32.mrb[4].mxu0  ;;  %v505_v29 = vpop.f32.mrb[4].mxu1 }
 0x123   :  { %v219_v30 = vpop.f32.mrb[5].mxu0  ;;  %v251_v31 = vpop.f32.mrb[5].mxu1 }
 0x124   :  { %v498_v32 = vpop.f32.mrb[6].mxu0  ;;  %v506_v33 = vpop.f32.mrb[6].mxu1 }
 0x125   :  { %v430_v34 = vpack.c.bf16 %v498_v32, %v497_v28  ;;  %v450_v35 = vpack.c.bf16 %v506_v33, %v505_v29  ;;  %v222_v36 = vpop.f32.mrb[7].mxu0  ;;  %v254_v37 = vpop.f32.mrb[7].mxu1 }
 0x126   :  { %v425_v38 = vpack.c.bf16 %v222_v36, %v219_v30  ;;  %v445_v39 = vpack.c.bf16 %v254_v37, %v251_v31 }
 0x127   :  { %454 = vst [vmem:[#allocation7 + $0x18] sm:$0xff] %v430_v34   ;;  %458 = vst [vmem:[#allocation7 + $0x38] sm:$0xff] %v450_v35  }
 0x128   :  { %453 = vst [vmem:[#allocation7 + $0x10] sm:$0xff] %v425_v38   ;;  %457 = vst [vmem:[#allocation7 + $0x30] sm:$0xff] %v445_v39  }
 0x129   :  { %599 = shalt.err (!%p596_p6)
}
 0x12a   :  { %s600_s10 = scalar_lea.hbm %s683_s2, 1024 }
 0x12b   :  { %p601_p7 = scmp.ne.s32.totalorder %s683_s2, %s600_s10  ;;  %p604_p8 = scmp.lt.u32.totalorder %s600_s10, %s683_s2 }
 0x12d   :  { %p606_p9 = pnand %p604_p8, %p601_p7 }
 0x12f   :  { %609 = shalt.err (!%p606_p9)
}
 0x130   :  { %357 = dma.vmem_to_hbm [thread:$0]  %s352_s6, 1024, %s683_s2, [#allocation4], %s617_s19, %s617_s19, %s618_s20  }
 0x131   :  { %614 = dma.done.wait [#allocation4], 1024  }
 0x132   :  { %615 = vsyncadd [#allocation4], 4294966272 }
 0x133   :  { %361 = vsyncpa [#allocation3], 1 }
 0x134   :  { %362 = vsyncpa [#allocation6], 1 }
 0x135   :  { %363 = vsyncpa [#allocation4], 1 }

// kernel: gcn_3_layer_edge_weight_fc_forward.7
= control target key start
LH: loop header
LB: loop body
LE: loop exit
PB: predicated region body
PF: predicated region fallthrough
CT: control target
= control target key end

     0   :  { %8 = vsyncpa [#allocation3], 0  ;;  %s767_s0 = inlined_call_operand.hbm [shape: bf16[128,128], index: 0, kind: input, shape index: {}]   ;;  %s768_s1 = inlined_call_operand.hbm [shape: bf16[128,128], index: 1, kind: input, shape index: {}]   ;;  %s769_s2 = inlined_call_operand.hbm [shape: f32[1,128], index: 2, kind: input, shape index: {}]   ;;  %s770_s3 = inlined_call_operand.hbm [shape: bf16[128,128], index: 3, kind: output, shape index: {}]  }
   0x1   :  { %9 = vsyncpa [#allocation6], 0 }
   0x2   :  { %10 = vsyncpa [#allocation4], 0  ;;  %s677_s12 = smov [#allocation5]   ;;  %s678_s14 = smov [#allocation2]  }
   0x3   :  { %s28_s13 = sshll.u32 %s677_s12, 4  ;;  %s16_s15 = sshll.u32 %s678_s14, 4  ;;  %s29_s13 = int_to_ptr.vmem [resolvable:$true] %s28_s13  ;;  %s703_s15 = int_to_ptr.vmem [resolvable:$true] %s16_s15 }
   0x4   :  { %s583_s18 = scalar_lea.hbm %s768_s1, 1024 }
   0x5   :  { %p584_p0 = scmp.ne.s32.totalorder %s768_s1, %s583_s18  ;;  %p587_p1 = scmp.lt.u32.totalorder %s583_s18, %s768_s1 }
   0x7   :  { %p589_p2 = pnand %p587_p1, %p584_p0 }
   0x9   :  { %592 = shalt.err (!%p589_p2)
}
   0xa   :  { %s593_s23 = scalar_lea.vmem %s29_s13, 1024  ;;  %p598_p4 = scmp.lt.s32.totalorder %s29_s13, %s29_s13 }
   0xb   :  { %p594_p3 = scmp.ne.s32.totalorder %s29_s13, %s593_s23  ;;  %p599_p5 = scmp.lt.s32.totalorder %s593_s23, %s593_s23 }
   0xd   :  { %p600_p6 = por %p599_p5, %p598_p4 }
   0xf   :  { %p601_p7 = pnand %p600_p6, %p594_p3 }
  0x11   :  { %604 = shalt.err (!%p601_p7)
}
  0x12   :  { %s679_s24 = smov 64   ;;  %s680_s25 = smov 4  }
  0x13   :  { %34 = dma.hbm_to_vmem [thread:$0]  %s768_s1, 1024, %s29_s13, [#allocation6], %s679_s24, %s679_s24, %s680_s25  }
  0x14   :  { %s605_s30 = scalar_lea.hbm %s767_s0, 1024 }
  0x15   :  { %p606_p8 = scmp.ne.s32.totalorder %s767_s0, %s605_s30  ;;  %p609_p9 = scmp.lt.u32.totalorder %s605_s30, %s767_s0 }
  0x17   :  { %p611_p10 = pnand %p609_p9, %p606_p8 }
  0x19   :  { %614 = shalt.err (!%p611_p10)
}
  0x1a   :  { %s615_s8 = scalar_lea.vmem %s703_s15, 1024  ;;  %p620_p12 = scmp.lt.s32.totalorder %s703_s15, %s703_s15 }
  0x1b   :  { %p616_p11 = scmp.ne.s32.totalorder %s703_s15, %s615_s8  ;;  %p621_p13 = scmp.lt.s32.totalorder %s615_s8, %s615_s8 }
  0x1d   :  { %p622_p0 = por %p621_p13, %p620_p12 }
  0x1f   :  { %p623_p1 = pnand %p622_p0, %p616_p11 }
  0x21   :  { %626 = shalt.err (!%p623_p1)
}
  0x22   :  { %22 = dma.hbm_to_vmem [thread:$0]  %s767_s0, 1024, %s703_s15, [#allocation3], %s679_s24, %s679_s24, %s680_s25  }
  0x23   :  { %s681_s10 = smov [#allocation7]   ;;  %s627_s14 = scalar_lea.hbm %s769_s2, 16 }
  0x24   :  { %s41_s11 = sshll.u32 %s681_s10, 4  ;;  %p628_p2 = scmp.ne.s32.totalorder %s769_s2, %s627_s14  ;;  %s42_s11 = int_to_ptr.vmem [resolvable:$true] %s41_s11 }
  0x25   :  { %p631_p3 = scmp.lt.u32.totalorder %s627_s14, %s769_s2 }
  0x27   :  { %p633_p4 = pnand %p631_p3, %p628_p2 }
  0x29   :  { %636 = shalt.err (!%p633_p4)
}
  0x2a   :  { %s637_s20 = scalar_lea.vmem %s42_s11, 16  ;;  %s641_s0 = scalar_lea.vmem %s42_s11, 32 }
  0x2b   :  { %p638_p5 = scmp.ne.s32.totalorder %s42_s11, %s637_s20  ;;  %p642_p6 = scmp.lt.s32.totalorder %s42_s11, %s42_s11 }
  0x2c   :  { %p643_p7 = scmp.lt.s32.totalorder %s641_s0, %s637_s20 }
  0x2e   :  { %p644_p8 = por %p643_p7, %p642_p6 }
  0x30   :  { %p645_p9 = pnand %p644_p8, %p638_p5 }
  0x32   :  { %648 = shalt.err (!%p645_p9)
}
  0x33   :  { %44 = dma.hbm_to_vmem [thread:$0]  %s769_s2, 16, %s42_s11, [#allocation6]  }
  0x34   :  { %671 = dma.done.wait [#allocation3], 1024  }
  0x35   :  { %672 = vsyncadd [#allocation3], 4294966272 }
  0x36   :  { %673 = dma.done.wait [#allocation6], 1040  }
  0x37   :  { %674 = vsyncadd [#allocation6], 4294966256  ;;  %v567_v0 = vld [vmem:[#allocation5] sm:$0xff]   ;;  %v568_v1 = vld [vmem:[#allocation5 + $0x8] sm:$0xff]   ;;  %s682_s2 = smov [#allocation8]  }
  0x38   :  { %513 = vmatprep.subr.bf16.mxu0 %v567_v0  ;;  %545 = vmatprep.subr.bf16.mxu1 %v567_v0  ;;  %v569_v2 = vld [vmem:[#allocation5 + $0x10] sm:$0xff]   ;;  %v570_v3 = vld [vmem:[#allocation5 + $0x18] sm:$0xff]   ;;  %v575_v4 = vld [vmem:[#allocation2] sm:$0xff]   ;;  %s388_s22 = sshll.u32 %s682_s2, 4  ;;  %s389_s22 = int_to_ptr.vmem [resolvable:$true] %s388_s22 }
  0x39   :  { %514 = vmatpush3.bf16.msra.mxu0 %v567_v0  ;;  %553 = vmatpush3.bf16.msra.mxu1 %v567_v0  ;;  %v576_v5 = vld [vmem:[#allocation2 + $0x20] sm:$0xff]   ;;  %v572_v7 = vld [vmem:[#allocation5 + $0x28] sm:$0xff]   ;;  %v573_v8 = vld [vmem:[#allocation5 + $0x30] sm:$0xff]   ;;  %s649_s23 = scalar_lea.vmem %s389_s22, 1024  ;;  %p654_p11 = scmp.lt.s32.totalorder %s389_s22, %s389_s22 }
  0x3a   :  { %515 = vmatprep.subr.bf16.mxu0 %v568_v1  ;;  %546 = vmatprep.subr.bf16.mxu1 %v568_v1  ;;  %v571_v6 = vld [vmem:[#allocation5 + $0x20] sm:$0xff]   ;;  %v574_v9 = vld [vmem:[#allocation5 + $0x38] sm:$0xff]   ;;  %v577_v10 = vld [vmem:[#allocation2 + $0x8] sm:$0xff]   ;;  %p650_p10 = scmp.ne.s32.totalorder %s389_s22, %s649_s23  ;;  %p655_p12 = scmp.lt.s32.totalorder %s649_s23, %s649_s23 }
  0x3b   :  { %529 = vmatprep.mubr.bf16.mxu0 %v575_v4  ;;  %537 = vmatprep.mubr.bf16.mxu1 %v576_v5  ;;  %v578_v11 = vld [vmem:[#allocation2 + $0x28] sm:$0xff]   ;;  %v579_v12 = vld [vmem:[#allocation2 + $0x10] sm:$0xff]   ;;  %v581_v14 = vld [vmem:[#allocation2 + $0x18] sm:$0xff]  }
  0x3c   :  { %v580_v13 = vld [vmem:[#allocation2 + $0x30] sm:$0xff]   ;;  %v582_v15 = vld [vmem:[#allocation2 + $0x38] sm:$0xff]   ;;  %v401_v16 = vld [vmem:[#allocation7] ss:$0 sm:$0xff]  ;;  %p656_p13 = por %p655_p12, %p654_p11 }
  0x3d   :  { %516 = vmatpush3.bf16.msra.mxu0 %v568_v1  ;;  %554 = vmatpush3.bf16.msra.mxu1 %v568_v1 }
  0x3e   :  { %517 = vmatprep.subr.bf16.mxu0 %v569_v2  ;;  %547 = vmatprep.subr.bf16.mxu1 %v569_v2  ;;  %p657_p0 = pnand %p656_p13, %p650_p10 }
  0x41   :  { %518 = vmatpush3.bf16.msra.mxu0 %v569_v2  ;;  %555 = vmatpush3.bf16.msra.mxu1 %v569_v2 }
  0x42   :  { %519 = vmatprep.subr.bf16.mxu0 %v570_v3  ;;  %548 = vmatprep.subr.bf16.mxu1 %v570_v3 }
  0x45   :  { %520 = vmatpush3.bf16.msra.mxu0 %v570_v3  ;;  %556 = vmatpush3.bf16.msra.mxu1 %v570_v3 }
  0x46   :  { %521 = vmatprep.subr.bf16.mxu0 %v571_v6  ;;  %549 = vmatprep.subr.bf16.mxu1 %v571_v6 }
  0x49   :  { %522 = vmatpush3.bf16.msra.mxu0 %v571_v6  ;;  %557 = vmatpush3.bf16.msra.mxu1 %v571_v6 }
  0x4a   :  { %523 = vmatprep.subr.bf16.mxu0 %v572_v7  ;;  %550 = vmatprep.subr.bf16.mxu1 %v572_v7 }
  0x4d   :  { %524 = vmatpush3.bf16.msra.mxu0 %v572_v7  ;;  %558 = vmatpush3.bf16.msra.mxu1 %v572_v7 }
  0x4e   :  { %525 = vmatprep.subr.bf16.mxu0 %v573_v8  ;;  %551 = vmatprep.subr.bf16.mxu1 %v573_v8 }
  0x51   :  { %526 = vmatpush3.bf16.msra.mxu0 %v573_v8  ;;  %559 = vmatpush3.bf16.msra.mxu1 %v573_v8 }
  0x52   :  { %527 = vmatprep.subr.bf16.mxu0 %v574_v9  ;;  %552 = vmatprep.subr.bf16.mxu1 %v574_v9 }
  0x55   :  { %528 = vmatpush3.bf16.msra.mxu0 %v574_v9  ;;  %560 = vmatpush3.bf16.msra.mxu1 %v574_v9 }
  0x58   :  { %530 = vmatmul.mubr.bf16.vlgmr.msra.gmra.mrb[0].mxu0 %v577_v10  ;;  %538 = vmatmul.mubr.bf16.vlgmr.msra.gmra.mrb[0].mxu1 %v578_v11 }
  0x59   :  { %533 = vmatprep.mubr.bf16.mxu0 %v579_v12  ;;  %541 = vmatprep.mubr.bf16.mxu1 %v580_v13 }
  0x60   :  { %534 = vmatmul.mubr.bf16.gmra.mrb[4].mxu0 %v581_v14  ;;  %542 = vmatmul.mubr.bf16.gmra.mrb[4].mxu1 %v582_v15 }
 0x12b   :  { %v531_v17 = vpop.f32.mrb[0].mxu0  ;;  %v539_v18 = vpop.f32.mrb[0].mxu1 }
 0x12c   :  { %v233_v19 = vadd.f32 %v531_v17, %v401_v16  ;;  %v265_v20 = vadd.f32 %v539_v18, %v401_v16  ;;  %v224_v21 = vpop.f32.mrb[1].mxu0  ;;  %v256_v22 = vpop.f32.mrb[1].mxu1 }
 0x12d   :  { %v225_v23 = vadd.f32 %v401_v16, %v224_v21  ;;  %v257_v24 = vadd.f32 %v401_v16, %v256_v22  ;;  %v532_v25 = vpop.f32.mrb[2].mxu0  ;;  %v540_v26 = vpop.f32.mrb[2].mxu1 }
 0x12e   :  { %v236_v27 = vadd.f32 %v532_v25, %v401_v16  ;;  %v268_v28 = vadd.f32 %v540_v26, %v401_v16  ;;  %v227_v29 = vpop.f32.mrb[3].mxu0  ;;  %v259_v30 = vpop.f32.mrb[3].mxu1  ;;  %v289_v33 = vmax.f32 %v233_v19, 0.0  ;;  %v297_v34 = vmax.f32 %v265_v20, 0.0 }
 0x12f   :  { %v228_v31 = vadd.f32 %v401_v16, %v227_v29  ;;  %v260_v32 = vadd.f32 %v401_v16, %v259_v30  ;;  %v287_v37 = vmax.f32 %v225_v23, 0.0  ;;  %v295_v38 = vmax.f32 %v257_v24, 0.0 }
 0x130   :  { %v290_v35 = vmax.f32 %v236_v27, 0.0  ;;  %v298_v36 = vmax.f32 %v268_v28, 0.0 }
 0x131   :  { %v288_v39 = vmax.f32 %v228_v31, 0.0  ;;  %v296_v40 = vmax.f32 %v260_v32, 0.0 }
 0x132   :  { %v458_v41 = vpack.c.bf16 %v290_v35, %v289_v33  ;;  %v478_v42 = vpack.c.bf16 %v298_v36, %v297_v34 }
 0x133   :  { %v453_v43 = vpack.c.bf16 %v288_v39, %v287_v37  ;;  %v473_v44 = vpack.c.bf16 %v296_v40, %v295_v38  ;;  %v535_v45 = vpop.f32.mrb[4].mxu0  ;;  %v543_v46 = vpop.f32.mrb[4].mxu1 }
 0x134   :  { %490 = vst [vmem:[#allocation8 + $0x8] sm:$0xff] %v458_v41   ;;  %494 = vst [vmem:[#allocation8 + $0x28] sm:$0xff] %v478_v42   ;;  %v249_v47 = vadd.f32 %v535_v45, %v401_v16  ;;  %v281_v48 = vadd.f32 %v543_v46, %v401_v16  ;;  %v240_v49 = vpop.f32.mrb[5].mxu0  ;;  %v272_v50 = vpop.f32.mrb[5].mxu1 }
 0x135   :  { %454 = vst [vmem:[#allocation8] sm:$0xff] %v453_v43   ;;  %493 = vst [vmem:[#allocation8 + $0x20] sm:$0xff] %v473_v44   ;;  %v241_v51 = vadd.f32 %v401_v16, %v240_v49  ;;  %v273_v52 = vadd.f32 %v401_v16, %v272_v50  ;;  %v536_v53 = vpop.f32.mrb[6].mxu0  ;;  %v544_v54 = vpop.f32.mrb[6].mxu1 }
 0x136   :  { %v252_v55 = vadd.f32 %v536_v53, %v401_v16  ;;  %v284_v56 = vadd.f32 %v544_v54, %v401_v16  ;;  %v243_v57 = vpop.f32.mrb[7].mxu0  ;;  %v275_v58 = vpop.f32.mrb[7].mxu1  ;;  %v293_v61 = vmax.f32 %v249_v47, 0.0  ;;  %v301_v62 = vmax.f32 %v281_v48, 0.0 }
 0x137   :  { %v244_v59 = vadd.f32 %v401_v16, %v243_v57  ;;  %v276_v60 = vadd.f32 %v401_v16, %v275_v58  ;;  %v291_v1 = vmax.f32 %v241_v51, 0.0  ;;  %v299_v2 = vmax.f32 %v273_v52, 0.0 }
 0x138   :  { %v294_v63 = vmax.f32 %v252_v55, 0.0  ;;  %v302_v0 = vmax.f32 %v284_v56, 0.0 }
 0x139   :  { %v292_v3 = vmax.f32 %v244_v59, 0.0  ;;  %v300_v4 = vmax.f32 %v276_v60, 0.0 }
 0x13a   :  { %v468_v5 = vpack.c.bf16 %v294_v63, %v293_v61  ;;  %v488_v6 = vpack.c.bf16 %v302_v0, %v301_v62 }
 0x13b   :  { %v463_v7 = vpack.c.bf16 %v292_v3, %v291_v1  ;;  %v483_v8 = vpack.c.bf16 %v300_v4, %v299_v2 }
 0x13c   :  { %492 = vst [vmem:[#allocation8 + $0x18] sm:$0xff] %v468_v5   ;;  %496 = vst [vmem:[#allocation8 + $0x38] sm:$0xff] %v488_v6  }
 0x13d   :  { %491 = vst [vmem:[#allocation8 + $0x10] sm:$0xff] %v463_v7   ;;  %495 = vst [vmem:[#allocation8 + $0x30] sm:$0xff] %v483_v8  }
 0x13e   :  { %660 = shalt.err (!%p657_p0)
}
 0x13f   :  { %s661_s28 = scalar_lea.hbm %s770_s3, 1024 }
 0x140   :  { %p662_p1 = scmp.ne.s32.totalorder %s770_s3, %s661_s28  ;;  %p665_p2 = scmp.lt.u32.totalorder %s661_s28, %s770_s3 }
 0x142   :  { %p667_p3 = pnand %p665_p2, %p662_p1 }
 0x144   :  { %670 = shalt.err (!%p667_p3)
}
 0x145   :  { %394 = dma.vmem_to_hbm [thread:$0]  %s389_s22, 1024, %s770_s3, [#allocation4], %s679_s24, %s679_s24, %s680_s25  }
 0x146   :  { %675 = dma.done.wait [#allocation4], 1024  }
 0x147   :  { %676 = vsyncadd [#allocation4], 4294966272 }
 0x148   :  { %398 = vsyncpa [#allocation3], 1 }
 0x149   :  { %399 = vsyncpa [#allocation6], 1 }
 0x14a   :  { %400 = vsyncpa [#allocation4], 1 }

// kernel: gcn_3_layer_edge_weight_fc_forward.11
= control target key start
LH: loop header
LB: loop body
LE: loop exit
PB: predicated region body
PF: predicated region fallthrough
CT: control target
= control target key end

     0   :  { %13 = vsyncpa [#allocation3], 0  ;;  %s1543_s0 = inlined_call_operand.hbm [shape: bf16[128,128], index: 0, kind: input, shape index: {}]   ;;  %s1544_s1 = inlined_call_operand.hbm [shape: bf16[128,128], index: 1, kind: input, shape index: {}]   ;;  %s1545_s2 = inlined_call_operand.hbm [shape: f32[1,128], index: 2, kind: input, shape index: {}]   ;;  %s1546_s3 = inlined_call_operand.hbm [shape: bf16[128,128], index: 3, kind: input, shape index: {}]   ;;  %s1547_s4 = inlined_call_operand.hbm [shape: bf16[128,128], index: 4, kind: input, shape index: {}]   ;;  %s1548_s5 = inlined_call_operand.hbm [shape: f32[1,128], index: 5, kind: input, shape index: {}]   ;;  %s1549_s6 = inlined_call_operand.hbm [shape: bf16[128,128], index: 6, kind: input, shape index: {}]   ;;  %s1550_s7 = inlined_call_operand.hbm [shape: f32[1,128], index: 7, kind: input, shape index: {}]   ;;  %s1551_s8 = inlined_call_operand.hbm [shape: f32[128,128], index: 8, kind: output, shape index: {}]  }
   0x1   :  { %14 = vsyncpa [#allocation6], 0 }
   0x2   :  { %15 = vsyncpa [#allocation9], 0 }
   0x3   :  { %16 = vsyncpa [#allocation12], 0 }
   0x4   :  { %17 = vsyncpa [#allocation15], 0 }
   0x5   :  { %18 = vsyncpa [#allocation4], 0  ;;  %s1341_s27 = smov [#allocation5]   ;;  %s1342_s29 = smov [#allocation8]  }
   0x6   :  { %s36_s28 = sshll.u32 %s1341_s27, 4  ;;  %s58_s30 = sshll.u32 %s1342_s29, 4  ;;  %s37_s28 = int_to_ptr.vmem [resolvable:$true] %s36_s28  ;;  %s1399_s30 = int_to_ptr.vmem [resolvable:$true] %s58_s30 }
   0x7   :  { %s1131_s11 = scalar_lea.hbm %s1544_s1, 1024 }
   0x8   :  { %p1132_p0 = scmp.ne.s32.totalorder %s1544_s1, %s1131_s11  ;;  %p1135_p1 = scmp.lt.u32.totalorder %s1131_s11, %s1544_s1 }
   0xa   :  { %p1137_p2 = pnand %p1135_p1, %p1132_p0 }
   0xc   :  { %1140 = shalt.err (!%p1137_p2)
}
   0xd   :  { %s1141_s16 = scalar_lea.vmem %s37_s28, 1024  ;;  %p1146_p4 = scmp.lt.s32.totalorder %s37_s28, %s37_s28 }
   0xe   :  { %p1142_p3 = scmp.ne.s32.totalorder %s37_s28, %s1141_s16  ;;  %p1147_p5 = scmp.lt.s32.totalorder %s1141_s16, %s1141_s16 }
  0x10   :  { %p1148_p6 = por %p1147_p5, %p1146_p4 }
  0x12   :  { %p1149_p7 = pnand %p1148_p6, %p1142_p3 }
  0x14   :  { %1152 = shalt.err (!%p1149_p7)
}
  0x15   :  { %s1343_s17 = smov 64   ;;  %s1344_s18 = smov 4  }
  0x16   :  { %42 = dma.hbm_to_vmem [thread:$0]  %s1544_s1, 1024, %s37_s28, [#allocation6], %s1343_s17, %s1343_s17, %s1344_s18  }
  0x17   :  { %s1153_s23 = scalar_lea.hbm %s1546_s3, 1024 }
  0x18   :  { %p1154_p8 = scmp.ne.s32.totalorder %s1546_s3, %s1153_s23  ;;  %p1157_p9 = scmp.lt.u32.totalorder %s1153_s23, %s1546_s3 }
  0x1a   :  { %p1159_p10 = pnand %p1157_p9, %p1154_p8 }
  0x1c   :  { %1162 = shalt.err (!%p1159_p10)
}
  0x1d   :  { %s1163_s29 = scalar_lea.vmem %s1399_s30, 1024  ;;  %p1168_p12 = scmp.lt.s32.totalorder %s1399_s30, %s1399_s30 }
  0x1e   :  { %p1164_p11 = scmp.ne.s32.totalorder %s1399_s30, %s1163_s29  ;;  %p1169_p13 = scmp.lt.s32.totalorder %s1163_s29, %s1163_s29 }
  0x20   :  { %p1170_p0 = por %p1169_p13, %p1168_p12 }
  0x22   :  { %p1171_p1 = pnand %p1170_p0, %p1164_p11 }
  0x24   :  { %1174 = shalt.err (!%p1171_p1)
}
  0x25   :  { %64 = dma.hbm_to_vmem [thread:$0]  %s1546_s3, 1024, %s1399_s30, [#allocation9], %s1343_s17, %s1343_s17, %s1344_s18  }
  0x26   :  { %s1345_s9 = smov [#allocation11]   ;;  %s1346_s11 = smov [#allocation2]  }
  0x27   :  { %s83_s10 = sshll.u32 %s1345_s9, 4  ;;  %s24_s12 = sshll.u32 %s1346_s11, 4  ;;  %s84_s10 = int_to_ptr.vmem [resolvable:$true] %s83_s10  ;;  %s1436_s12 = int_to_ptr.vmem [resolvable:$true] %s24_s12 }
  0x28   :  { %s1175_s15 = scalar_lea.hbm %s1548_s5, 16 }
  0x29   :  { %p1176_p2 = scmp.ne.s32.totalorder %s1548_s5, %s1175_s15  ;;  %p1179_p3 = scmp.lt.u32.totalorder %s1175_s15, %s1548_s5 }
  0x2b   :  { %p1181_p4 = pnand %p1179_p3, %p1176_p2 }
  0x2d   :  { %1184 = shalt.err (!%p1181_p4)
}
  0x2e   :  { %s1185_s3 = scalar_lea.vmem %s84_s10, 16  ;;  %s1189_s30 = scalar_lea.vmem %s84_s10, 32 }
  0x2f   :  { %p1186_p5 = scmp.ne.s32.totalorder %s84_s10, %s1185_s3  ;;  %p1190_p6 = scmp.lt.s32.totalorder %s84_s10, %s84_s10 }
  0x30   :  { %p1191_p7 = scmp.lt.s32.totalorder %s1189_s30, %s1185_s3 }
  0x32   :  { %p1192_p8 = por %p1191_p7, %p1190_p6 }
  0x34   :  { %p1193_p9 = pnand %p1192_p8, %p1186_p5 }
  0x36   :  { %1196 = shalt.err (!%p1193_p9)
}
  0x37   :  { %86 = dma.hbm_to_vmem [thread:$0]  %s1548_s5, 16, %s84_s10, [#allocation12]  }
  0x38   :  { %s1197_s26 = scalar_lea.hbm %s1543_s0, 1024 }
  0x39   :  { %p1198_p10 = scmp.ne.s32.totalorder %s1543_s0, %s1197_s26  ;;  %p1201_p11 = scmp.lt.u32.totalorder %s1197_s26, %s1543_s0 }
  0x3b   :  { %p1203_p12 = pnand %p1201_p11, %p1198_p10 }
  0x3d   :  { %1206 = shalt.err (!%p1203_p12)
}
  0x3e   :  { %s1207_s9 = scalar_lea.vmem %s1436_s12, 1024  ;;  %p1212_p0 = scmp.lt.s32.totalorder %s1436_s12, %s1436_s12 }
  0x3f   :  { %p1208_p13 = scmp.ne.s32.totalorder %s1436_s12, %s1207_s9  ;;  %p1213_p1 = scmp.lt.s32.totalorder %s1207_s9, %s1207_s9 }
  0x41   :  { %p1214_p2 = por %p1213_p1, %p1212_p0 }
  0x43   :  { %p1215_p3 = pnand %p1214_p2, %p1208_p13 }
  0x45   :  { %1218 = shalt.err (!%p1215_p3)
}
  0x46   :  { %30 = dma.hbm_to_vmem [thread:$0]  %s1543_s0, 1024, %s1436_s12, [#allocation3], %s1343_s17, %s1343_s17, %s1344_s18  }
  0x47   :  { %s1347_s11 = smov [#allocation7]   ;;  %s1348_s14 = smov [#allocation10]  }
  0x48   :  { %s49_s13 = sshll.u32 %s1347_s11, 4  ;;  %s70_s15 = sshll.u32 %s1348_s14, 4  ;;  %s50_s13 = int_to_ptr.vmem [resolvable:$true] %s49_s13  ;;  %s1470_s15 = int_to_ptr.vmem [resolvable:$true] %s70_s15 }
  0x49   :  { %s1219_s20 = scalar_lea.hbm %s1545_s2, 16 }
  0x4a   :  { %p1220_p4 = scmp.ne.s32.totalorder %s1545_s2, %s1219_s20  ;;  %p1223_p5 = scmp.lt.u32.totalorder %s1219_s20, %s1545_s2 }
  0x4c   :  { %p1225_p6 = pnand %p1223_p5, %p1220_p4 }
  0x4e   :  { %1228 = shalt.err (!%p1225_p6)
}
  0x4f   :  { %s1229_s0 = scalar_lea.vmem %s50_s13, 16  ;;  %s1233_s12 = scalar_lea.vmem %s50_s13, 32 }
  0x50   :  { %p1230_p7 = scmp.ne.s32.totalorder %s50_s13, %s1229_s0  ;;  %p1234_p8 = scmp.lt.s32.totalorder %s50_s13, %s50_s13 }
  0x51   :  { %p1235_p9 = scmp.lt.s32.totalorder %s1233_s12, %s1229_s0 }
  0x53   :  { %p1236_p10 = por %p1235_p9, %p1234_p8 }
  0x55   :  { %p1237_p11 = pnand %p1236_p10, %p1230_p7 }
  0x57   :  { %1240 = shalt.err (!%p1237_p11)
}
  0x58   :  { %52 = dma.hbm_to_vmem [thread:$0]  %s1545_s2, 16, %s50_s13, [#allocation6]  }
  0x59   :  { %s1241_s27 = scalar_lea.hbm %s1547_s4, 1024 }
  0x5a   :  { %p1242_p12 = scmp.ne.s32.totalorder %s1547_s4, %s1241_s27  ;;  %p1245_p13 = scmp.lt.u32.totalorder %s1241_s27, %s1547_s4 }
  0x5c   :  { %p1247_p0 = pnand %p1245_p13, %p1242_p12 }
  0x5e   :  { %1250 = shalt.err (!%p1247_p0)
}
  0x5f   :  { %s1251_s5 = scalar_lea.vmem %s1470_s15, 1024  ;;  %p1256_p2 = scmp.lt.s32.totalorder %s1470_s15, %s1470_s15 }
  0x60   :  { %p1252_p1 = scmp.ne.s32.totalorder %s1470_s15, %s1251_s5  ;;  %p1257_p3 = scmp.lt.s32.totalorder %s1251_s5, %s1251_s5 }
  0x62   :  { %p1258_p4 = por %p1257_p3, %p1256_p2 }
  0x64   :  { %p1259_p5 = pnand %p1258_p4, %p1252_p1 }
  0x66   :  { %1262 = shalt.err (!%p1259_p5)
}
  0x67   :  { %76 = dma.hbm_to_vmem [thread:$0]  %s1547_s4, 1024, %s1470_s15, [#allocation9], %s1343_s17, %s1343_s17, %s1344_s18  }
  0x68   :  { %s1349_s11 = smov [#allocation13]   ;;  %s1350_s14 = smov [#allocation14]  }
  0x69   :  { %s92_s13 = sshll.u32 %s1349_s11, 4  ;;  %s105_s16 = sshll.u32 %s1350_s14, 4  ;;  %s93_s13 = int_to_ptr.vmem [resolvable:$true] %s92_s13  ;;  %s106_s16 = int_to_ptr.vmem [resolvable:$true] %s105_s16 }
  0x6a   :  { %s1263_s21 = scalar_lea.hbm %s1549_s6, 1024 }
  0x6b   :  { %p1264_p6 = scmp.ne.s32.totalorder %s1549_s6, %s1263_s21  ;;  %p1267_p7 = scmp.lt.u32.totalorder %s1263_s21, %s1549_s6 }
  0x6d   :  { %p1269_p8 = pnand %p1267_p7, %p1264_p6 }
  0x6f   :  { %1272 = shalt.err (!%p1269_p8)
}
  0x70   :  { %s1273_s4 = scalar_lea.vmem %s93_s13, 1024  ;;  %p1278_p10 = scmp.lt.s32.totalorder %s93_s13, %s93_s13 }
  0x71   :  { %p1274_p9 = scmp.ne.s32.totalorder %s93_s13, %s1273_s4  ;;  %p1279_p11 = scmp.lt.s32.totalorder %s1273_s4, %s1273_s4 }
  0x73   :  { %p1280_p12 = por %p1279_p11, %p1278_p10 }
  0x75   :  { %p1281_p13 = pnand %p1280_p12, %p1274_p9 }
  0x77   :  { %1284 = shalt.err (!%p1281_p13)
}
  0x78   :  { %98 = dma.hbm_to_vmem [thread:$0]  %s1549_s6, 1024, %s93_s13, [#allocation12], %s1343_s17, %s1343_s17, %s1344_s18  }
  0x79   :  { %s1285_s25 = scalar_lea.hbm %s1550_s7, 16 }
  0x7a   :  { %p1286_p0 = scmp.ne.s32.totalorder %s1550_s7, %s1285_s25  ;;  %p1289_p1 = scmp.lt.u32.totalorder %s1285_s25, %s1550_s7 }
  0x7c   :  { %p1291_p2 = pnand %p1289_p1, %p1286_p0 }
  0x7e   :  { %1294 = shalt.err (!%p1291_p2)
}
  0x7f   :  { %s1295_s28 = scalar_lea.vmem %s106_s16, 16  ;;  %s1299_s9 = scalar_lea.vmem %s106_s16, 32 }
  0x80   :  { %p1296_p3 = scmp.ne.s32.totalorder %s106_s16, %s1295_s28  ;;  %p1300_p4 = scmp.lt.s32.totalorder %s106_s16, %s106_s16 }
  0x81   :  { %p1301_p5 = scmp.lt.s32.totalorder %s1299_s9, %s1295_s28 }
  0x83   :  { %p1302_p6 = por %p1301_p5, %p1300_p4 }
  0x85   :  { %p1303_p7 = pnand %p1302_p6, %p1296_p3 }
  0x87   :  { %1306 = shalt.err (!%p1303_p7)
}
  0x88   :  { %108 = dma.hbm_to_vmem [thread:$0]  %s1550_s7, 16, %s106_s16, [#allocation15]  }
  0x89   :  { %1329 = dma.done.wait [#allocation3], 1024  }
  0x8a   :  { %1330 = vsyncadd [#allocation3], 4294966272 }
  0x8b   :  { %1331 = dma.done.wait [#allocation6], 1040  }
  0x8c   :  { %1332 = vsyncadd [#allocation6], 4294966256 }
  0x8d   :  { %1333 = dma.done.wait [#allocation9], 2048  }
  0x8e   :  { %1334 = vsyncadd [#allocation9], 4294965248 }
  0x8f   :  { %1335 = dma.done.wait [#allocation12], 1040  }
  0x90   :  { %1336 = vsyncadd [#allocation12], 4294966256 }
  0x91   :  { %1337 = dma.done.wait [#allocation15], 16  }
  0x92   :  { %1338 = vsyncadd [#allocation15], 4294967280  ;;  %v1091_v0 = vld [vmem:[#allocation5] sm:$0xff]   ;;  %v1092_v1 = vld [vmem:[#allocation5 + $0x8] sm:$0xff]   ;;  %s1351_s7 = smov [#allocation16]  }
  0x93   :  { %934 = vmatprep.subr.bf16.mxu0 %v1091_v0  ;;  %v1093_v2 = vld [vmem:[#allocation5 + $0x10] sm:$0xff]   ;;  %v1094_v3 = vld [vmem:[#allocation5 + $0x18] sm:$0xff]   ;;  %v1099_v4 = vld [vmem:[#allocation2] sm:$0xff]   ;;  %s827_s18 = sshll.u32 %s1351_s7, 4  ;;  %s828_s18 = int_to_ptr.vmem [resolvable:$true] %s827_s18 }
  0x94   :  { %935 = vmatpush3.bf16.msra.mxu0 %v1091_v0  ;;  %950 = vmatprep.mubr.bf16.mxu0 %v1099_v4  ;;  %v1095_v5 = vld [vmem:[#allocation5 + $0x20] sm:$0xff]   ;;  %v1096_v6 = vld [vmem:[#allocation5 + $0x28] sm:$0xff]   ;;  %v1097_v7 = vld [vmem:[#allocation5 + $0x30] sm:$0xff]   ;;  %s1307_s5 = scalar_lea.vmem %s828_s18, 2048  ;;  %p1312_p9 = scmp.lt.s32.totalorder %s828_s18, %s828_s18 }
  0x95   :  { %936 = vmatprep.subr.bf16.mxu0 %v1092_v1  ;;  %v1098_v8 = vld [vmem:[#allocation5 + $0x38] sm:$0xff]   ;;  %v1101_v9 = vld [vmem:[#allocation10] sm:$0xff]   ;;  %v1102_v11 = vld [vmem:[#allocation10 + $0x8] sm:$0xff]   ;;  %p1308_p8 = scmp.ne.s32.totalorder %s828_s18, %s1307_s5  ;;  %p1313_p10 = scmp.lt.s32.totalorder %s1307_s5, %s1307_s5 }
  0x96   :  { %v1100_v10 = vld [vmem:[#allocation2 + $0x8] sm:$0xff]   ;;  %v1103_v12 = vld [vmem:[#allocation2 + $0x10] sm:$0xff]   ;;  %v1104_v17 = vld [vmem:[#allocation2 + $0x18] sm:$0xff]  }
  0x97   :  { %v1123_v13 = vld [vmem:[#allocation13] sm:$0xff]   ;;  %v1124_v14 = vld [vmem:[#allocation13 + $0x8] sm:$0xff]   ;;  %v1125_v16 = vld [vmem:[#allocation13 + $0x10] sm:$0xff]   ;;  %p1314_p11 = por %p1313_p10, %p1312_p9 }
  0x98   :  { %937 = vmatpush3.bf16.msra.mxu0 %v1092_v1  ;;  %998 = vmatprep.subr.bf16.mxu1 %v1123_v13  ;;  %v1105_v15 = vld [vmem:[#allocation10 + $0x10] sm:$0xff]   ;;  %v1107_v18 = vld [vmem:[#allocation2 + $0x20] sm:$0xff]   ;;  %v1108_v23 = vld [vmem:[#allocation2 + $0x28] sm:$0xff]  }
  0x99   :  { %938 = vmatprep.subr.bf16.mxu0 %v1093_v2  ;;  %999 = vmatpush3.bf16.msra.mxu1 %v1123_v13  ;;  %v1106_v19 = vld [vmem:[#allocation10 + $0x18] sm:$0xff]   ;;  %v1109_v21 = vld [vmem:[#allocation10 + $0x20] sm:$0xff]   ;;  %v1111_v24 = vld [vmem:[#allocation2 + $0x30] sm:$0xff]   ;;  %p1315_p12 = pnand %p1314_p11, %p1308_p8 }
  0x9a   :  { %1000 = vmatprep.subr.bf16.mxu1 %v1124_v14  ;;  %v1126_v20 = vld [vmem:[#allocation13 + $0x18] sm:$0xff]   ;;  %v1127_v22 = vld [vmem:[#allocation13 + $0x20] sm:$0xff]   ;;  %v1128_v26 = vld [vmem:[#allocation13 + $0x28] sm:$0xff]  }
  0x9b   :  { %v1110_v25 = vld [vmem:[#allocation10 + $0x28] sm:$0xff]   ;;  %v1113_v27 = vld [vmem:[#allocation10 + $0x30] sm:$0xff]   ;;  %v1115_v29 = vld [vmem:[#allocation8] sm:$0xff]  }
  0x9c   :  { %939 = vmatpush3.bf16.msra.mxu0 %v1093_v2  ;;  %v1112_v28 = vld [vmem:[#allocation2 + $0x38] sm:$0xff]   ;;  %v1116_v31 = vld [vmem:[#allocation8 + $0x8] sm:$0xff]   ;;  %v1119_v34 = vld [vmem:[#allocation8 + $0x20] sm:$0xff]  }
  0x9d   :  { %940 = vmatprep.subr.bf16.mxu0 %v1094_v3  ;;  %1001 = vmatpush3.bf16.msra.mxu1 %v1124_v14  ;;  %v1114_v30 = vld [vmem:[#allocation10 + $0x38] sm:$0xff]   ;;  %v1117_v32 = vld [vmem:[#allocation8 + $0x10] sm:$0xff]   ;;  %v1120_v35 = vld [vmem:[#allocation8 + $0x28] sm:$0xff]  }
  0x9e   :  { %1002 = vmatprep.subr.bf16.mxu1 %v1125_v16  ;;  %v1118_v33 = vld [vmem:[#allocation8 + $0x18] sm:$0xff]   ;;  %v1121_v36 = vld [vmem:[#allocation8 + $0x30] sm:$0xff]   ;;  %v860_v41 = vld [vmem:[#allocation11] ss:$0 sm:$0xff] }
  0x9f   :  { %v1122_v37 = vld [vmem:[#allocation8 + $0x38] sm:$0xff]  }
  0xa0   :  { %941 = vmatpush3.bf16.msra.mxu0 %v1094_v3  ;;  %v1129_v38 = vld [vmem:[#allocation13 + $0x30] sm:$0xff]   ;;  %v1130_v39 = vld [vmem:[#allocation13 + $0x38] sm:$0xff]  }
  0xa1   :  { %942 = vmatprep.subr.bf16.mxu0 %v1095_v5  ;;  %1003 = vmatpush3.bf16.msra.mxu1 %v1125_v16  ;;  %v843_v40 = vld [vmem:[#allocation7] ss:$0 sm:$0xff] }
  0xa2   :  { %1004 = vmatprep.subr.bf16.mxu1 %v1126_v20  ;;  %v1036_v42 = vadd.f32 %v860_v41, %v843_v40 }
  0xa4   :  { %943 = vmatpush3.bf16.msra.mxu0 %v1095_v5 }
  0xa5   :  { %944 = vmatprep.subr.bf16.mxu0 %v1096_v6  ;;  %1005 = vmatpush3.bf16.msra.mxu1 %v1126_v20 }
  0xa6   :  { %1006 = vmatprep.subr.bf16.mxu1 %v1127_v22 }
  0xa8   :  { %945 = vmatpush3.bf16.msra.mxu0 %v1096_v6 }
  0xa9   :  { %946 = vmatprep.subr.bf16.mxu0 %v1097_v7  ;;  %1007 = vmatpush3.bf16.msra.mxu1 %v1127_v22 }
  0xaa   :  { %1008 = vmatprep.subr.bf16.mxu1 %v1128_v26 }
  0xac   :  { %947 = vmatpush3.bf16.msra.mxu0 %v1097_v7 }
  0xad   :  { %948 = vmatprep.subr.bf16.mxu0 %v1098_v8  ;;  %1009 = vmatpush3.bf16.msra.mxu1 %v1128_v26 }
  0xae   :  { %1010 = vmatprep.subr.bf16.mxu1 %v1129_v38 }
  0xb0   :  { %949 = vmatpush3.bf16.msra.mxu0 %v1098_v8 }
  0xb1   :  { %966 = vmatprep.subr.bf16.mxu0 %v1101_v9  ;;  %1011 = vmatpush3.bf16.msra.mxu1 %v1129_v38 }
  0xb2   :  { %1012 = vmatprep.subr.bf16.mxu1 %v1130_v39 }
  0xb3   :  { %951 = vmatmul.mubr.bf16.vlgmr.msra.gmra.mrb[0].mxu0 %v1100_v10 }
  0xb4   :  { %967 = vmatpush3.bf16.msra.mxu0 %v1101_v9  ;;  %954 = vmatprep.mubr.bf16.mxu0 %v1103_v12 }
  0xb5   :  { %968 = vmatprep.subr.bf16.mxu0 %v1102_v11  ;;  %1013 = vmatpush3.bf16.msra.mxu1 %v1130_v39 }
  0xb8   :  { %969 = vmatpush3.bf16.msra.mxu0 %v1102_v11 }
  0xb9   :  { %970 = vmatprep.subr.bf16.mxu0 %v1105_v15 }
  0xbb   :  { %955 = vmatmul.mubr.bf16.gmra.mrb[4].mxu0 %v1104_v17 }
  0xbc   :  { %971 = vmatpush3.bf16.msra.mxu0 %v1105_v15  ;;  %958 = vmatprep.mubr.bf16.mxu0 %v1107_v18 }
  0xbd   :  { %972 = vmatprep.subr.bf16.mxu0 %v1106_v19 }
  0xc0   :  { %973 = vmatpush3.bf16.msra.mxu0 %v1106_v19 }
  0xc1   :  { %974 = vmatprep.subr.bf16.mxu0 %v1109_v21 }
  0xc3   :  { %959 = vmatmul.mubr.bf16.gmra.mrb[8].mxu0 %v1108_v23 }
  0xc4   :  { %975 = vmatpush3.bf16.msra.mxu0 %v1109_v21  ;;  %962 = vmatprep.mubr.bf16.mxu0 %v1111_v24 }
  0xc5   :  { %976 = vmatprep.subr.bf16.mxu0 %v1110_v25 }
  0xc8   :  { %977 = vmatpush3.bf16.msra.mxu0 %v1110_v25 }
  0xc9   :  { %978 = vmatprep.subr.bf16.mxu0 %v1113_v27 }
  0xcb   :  { %963 = vmatmul.mubr.bf16.gmra.mrb[12].mxu0 %v1112_v28 }
  0xcc   :  { %979 = vmatpush3.bf16.msra.mxu0 %v1113_v27  ;;  %982 = vmatprep.mubr.bf16.mxu0 %v1115_v29 }
  0xcd   :  { %980 = vmatprep.subr.bf16.mxu0 %v1114_v30 }
  0xd0   :  { %981 = vmatpush3.bf16.msra.mxu0 %v1114_v30 }
  0xd3   :  { %983 = vmatmul.mubr.bf16.vlgmr.msra.gmra.mrb[0].mxu0 %v1116_v31 }
  0xd4   :  { %986 = vmatprep.mubr.bf16.mxu0 %v1117_v32 }
  0xdb   :  { %987 = vmatmul.mubr.bf16.gmra.mrb[4].mxu0 %v1118_v33 }
  0xdc   :  { %990 = vmatprep.mubr.bf16.mxu0 %v1119_v34 }
  0xe3   :  { %991 = vmatmul.mubr.bf16.gmra.mrb[8].mxu0 %v1120_v35 }
  0xe4   :  { %994 = vmatprep.mubr.bf16.mxu0 %v1121_v36 }
  0xeb   :  { %995 = vmatmul.mubr.bf16.gmra.mrb[12].mxu0 %v1122_v37  ;;  %v877_v37 = vld [vmem:[#allocation14] ss:$0 sm:$0xff] }
 0x1a6   :  { %v984_v43 = vpop.f32.mrb[0].mxu0 }
 0x1a7   :  { %v1030_v44 = vadd.f32 %v984_v43, %v843_v40  ;;  %v535_v45 = vpop.f32.mrb[1].mxu0 }
 0x1a8   :  { %v1032_v46 = vadd.f32 %v843_v40, %v535_v45  ;;  %v985_v47 = vpop.f32.mrb[2].mxu0 }
 0x1a9   :  { %v1031_v48 = vadd.f32 %v1030_v44, %v860_v41  ;;  %v1035_v49 = vadd.f32 %v1036_v42, %v985_v47  ;;  %v538_v50 = vpop.f32.mrb[3].mxu0 }
 0x1aa   :  { %v1037_v51 = vadd.f32 %v1036_v42, %v538_v50  ;;  %v1033_v52 = vadd.f32 %v1032_v46, %v860_v41 }
 0x1ab   :  { %v616_v53 = vmax.f32 %v1031_v48, 0.0  ;;  %v617_v54 = vmax.f32 %v1035_v49, 0.0 }
 0x1ac   :  { %v615_v55 = vmax.f32 %v1037_v51, 0.0  ;;  %v614_v56 = vmax.f32 %v1033_v52, 0.0 }
 0x1ad   :  { %v631_v57 = vpack.c.bf16 %v617_v54, %v616_v53 }
 0x1ae   :  { %v988_v58 = vpop.f32.mrb[4].mxu0  ;;  %v630_v59 = vpack.c.bf16 %v615_v55, %v614_v56 }
 0x1af   :  { %v1039_v60 = vadd.f32 %v1036_v42, %v988_v58  ;;  %v551_v61 = vpop.f32.mrb[5].mxu0 }
 0x1b0   :  { %v1041_v62 = vadd.f32 %v1036_v42, %v551_v61  ;;  %v989_v63 = vpop.f32.mrb[6].mxu0  ;;  %1014 = vmatprep.mubr.bf16.mxu1 %v630_v59 }
 0x1b1   :  { %v1043_v0 = vadd.f32 %v1036_v42, %v989_v63  ;;  %v554_v1 = vpop.f32.mrb[7].mxu0  ;;  %1015 = vmatmul.mubr.bf16.vlgmr.msra.gmra.mrb[0].mxu1 %v631_v57  ;;  %v620_v3 = vmax.f32 %v1039_v60, 0.0 }
 0x1b2   :  { %v1045_v2 = vadd.f32 %v1036_v42, %v554_v1  ;;  %v618_v5 = vmax.f32 %v1041_v62, 0.0 }
 0x1b3   :  { %v621_v4 = vmax.f32 %v1043_v0, 0.0 }
 0x1b4   :  { %v619_v6 = vmax.f32 %v1045_v2, 0.0 }
 0x1b5   :  { %v633_v7 = vpack.c.bf16 %v621_v4, %v620_v3 }
 0x1b6   :  { %v632_v8 = vpack.c.bf16 %v619_v6, %v618_v5  ;;  %v992_v9 = vpop.f32.mrb[8].mxu0 }
 0x1b7   :  { %v1047_v10 = vadd.f32 %v1036_v42, %v992_v9  ;;  %v567_v11 = vpop.f32.mrb[9].mxu0 }
 0x1b8   :  { %v1049_v12 = vadd.f32 %v1036_v42, %v567_v11  ;;  %v993_v13 = vpop.f32.mrb[10].mxu0  ;;  %1018 = vmatprep.mubr.bf16.mxu1 %v632_v8 }
 0x1b9   :  { %v1051_v14 = vadd.f32 %v1036_v42, %v993_v13  ;;  %v570_v15 = vpop.f32.mrb[11].mxu0  ;;  %1019 = vmatmul.mubr.bf16.gmra.mrb[4].mxu1 %v633_v7  ;;  %v624_v17 = vmax.f32 %v1047_v10, 0.0 }
 0x1ba   :  { %v1053_v16 = vadd.f32 %v1036_v42, %v570_v15  ;;  %v622_v19 = vmax.f32 %v1049_v12, 0.0 }
 0x1bb   :  { %v625_v18 = vmax.f32 %v1051_v14, 0.0 }
 0x1bc   :  { %v623_v20 = vmax.f32 %v1053_v16, 0.0 }
 0x1bd   :  { %v635_v21 = vpack.c.bf16 %v625_v18, %v624_v17 }
 0x1be   :  { %v634_v22 = vpack.c.bf16 %v623_v20, %v622_v19  ;;  %v996_v23 = vpop.f32.mrb[12].mxu0 }
 0x1bf   :  { %v1055_v24 = vadd.f32 %v1036_v42, %v996_v23  ;;  %v583_v25 = vpop.f32.mrb[13].mxu0 }
 0x1c0   :  { %v1057_v26 = vadd.f32 %v1036_v42, %v583_v25  ;;  %v997_v27 = vpop.f32.mrb[14].mxu0  ;;  %1022 = vmatprep.mubr.bf16.mxu1 %v634_v22 }
 0x1c1   :  { %v1059_v28 = vadd.f32 %v1036_v42, %v997_v27  ;;  %v586_v29 = vpop.f32.mrb[15].mxu0  ;;  %1023 = vmatmul.mubr.bf16.gmra.mrb[8].mxu1 %v635_v21  ;;  %v628_v31 = vmax.f32 %v1055_v24, 0.0 }
 0x1c2   :  { %v1061_v30 = vadd.f32 %v1036_v42, %v586_v29  ;;  %v626_v33 = vmax.f32 %v1057_v26, 0.0 }
 0x1c3   :  { %v629_v32 = vmax.f32 %v1059_v28, 0.0 }
 0x1c4   :  { %v627_v34 = vmax.f32 %v1061_v30, 0.0 }
 0x1c5   :  { %v637_v35 = vpack.c.bf16 %v629_v32, %v628_v31 }
 0x1c6   :  { %v636_v36 = vpack.c.bf16 %v627_v34, %v626_v33 }
 0x1c8   :  { %1026 = vmatprep.mubr.bf16.mxu1 %v636_v36 }
 0x1c9   :  { %1027 = vmatmul.mubr.bf16.gmra.mrb[12].mxu1 %v637_v35 }
 0x284   :  { %v1016_v38 = vpop.f32.mrb[0].mxu1 }
 0x285   :  { %v752_v39 = vadd.f32 %v1016_v38, %v877_v37  ;;  %v743_v40 = vpop.f32.mrb[1].mxu1 }
 0x286   :  { %v744_v41 = vadd.f32 %v877_v37, %v743_v40  ;;  %v1017_v43 = vpop.f32.mrb[2].mxu1 }
 0x287   :  { %808 = vst [vmem:[#allocation16 + $0x10] sm:$0xff] %v752_v39  ;;  %v755_v44 = vadd.f32 %v1017_v43, %v877_v37  ;;  %v746_v45 = vpop.f32.mrb[3].mxu1 }
 0x288   :  { %806 = vst [vmem:[#allocation16] sm:$0xff] %v744_v41  ;;  %v747_v46 = vadd.f32 %v877_v37, %v746_v45 }
 0x289   :  { %809 = vst [vmem:[#allocation16 + $0x18] sm:$0xff] %v755_v44 }
 0x28a   :  { %807 = vst [vmem:[#allocation16 + $0x8] sm:$0xff] %v747_v46 }
 0x28c   :  { %v1020_v42 = vpop.f32.mrb[4].mxu1 }
 0x28d   :  { %v768_v47 = vadd.f32 %v1020_v42, %v877_v37  ;;  %v759_v48 = vpop.f32.mrb[5].mxu1 }
 0x28e   :  { %v760_v49 = vadd.f32 %v877_v37, %v759_v48  ;;  %v1021_v50 = vpop.f32.mrb[6].mxu1 }
 0x28f   :  { %812 = vst [vmem:[#allocation16 + $0x30] sm:$0xff] %v768_v47  ;;  %v771_v51 = vadd.f32 %v1021_v50, %v877_v37  ;;  %v762_v52 = vpop.f32.mrb[7].mxu1 }
 0x290   :  { %810 = vst [vmem:[#allocation16 + $0x20] sm:$0xff] %v760_v49  ;;  %v763_v53 = vadd.f32 %v877_v37, %v762_v52 }
 0x291   :  { %813 = vst [vmem:[#allocation16 + $0x38] sm:$0xff] %v771_v51 }
 0x292   :  { %811 = vst [vmem:[#allocation16 + $0x28] sm:$0xff] %v763_v53 }
 0x294   :  { %v1024_v54 = vpop.f32.mrb[8].mxu1 }
 0x295   :  { %v784_v55 = vadd.f32 %v1024_v54, %v877_v37  ;;  %v775_v56 = vpop.f32.mrb[9].mxu1 }
 0x296   :  { %v776_v57 = vadd.f32 %v877_v37, %v775_v56  ;;  %v1025_v58 = vpop.f32.mrb[10].mxu1 }
 0x297   :  { %816 = vst [vmem:[#allocation16 + $0x50] sm:$0xff] %v784_v55  ;;  %v787_v59 = vadd.f32 %v1025_v58, %v877_v37  ;;  %v778_v60 = vpop.f32.mrb[11].mxu1 }
 0x298   :  { %814 = vst [vmem:[#allocation16 + $0x40] sm:$0xff] %v776_v57  ;;  %v779_v61 = vadd.f32 %v877_v37, %v778_v60 }
 0x299   :  { %817 = vst [vmem:[#allocation16 + $0x58] sm:$0xff] %v787_v59 }
 0x29a   :  { %815 = vst [vmem:[#allocation16 + $0x48] sm:$0xff] %v779_v61 }
 0x29c   :  { %v1028_v62 = vpop.f32.mrb[12].mxu1 }
 0x29d   :  { %v800_v63 = vadd.f32 %v1028_v62, %v877_v37  ;;  %v791_v0 = vpop.f32.mrb[13].mxu1 }
 0x29e   :  { %v792_v1 = vadd.f32 %v877_v37, %v791_v0  ;;  %v1029_v2 = vpop.f32.mrb[14].mxu1 }
 0x29f   :  { %820 = vst [vmem:[#allocation16 + $0x70] sm:$0xff] %v800_v63  ;;  %v803_v3 = vadd.f32 %v1029_v2, %v877_v37  ;;  %v794_v4 = vpop.f32.mrb[15].mxu1 }
 0x2a0   :  { %818 = vst [vmem:[#allocation16 + $0x60] sm:$0xff] %v792_v1  ;;  %v795_v5 = vadd.f32 %v877_v37, %v794_v4 }
 0x2a1   :  { %821 = vst [vmem:[#allocation16 + $0x78] sm:$0xff] %v803_v3 }
 0x2a2   :  { %819 = vst [vmem:[#allocation16 + $0x68] sm:$0xff] %v795_v5 }
 0x2a3   :  { %1318 = shalt.err (!%p1315_p12)
}
 0x2a4   :  { %s1319_s11 = scalar_lea.hbm %s1551_s8, 2048 }
 0x2a5   :  { %p1320_p13 = scmp.ne.s32.totalorder %s1551_s8, %s1319_s11  ;;  %p1323_p0 = scmp.lt.u32.totalorder %s1319_s11, %s1551_s8 }
 0x2a7   :  { %p1325_p1 = pnand %p1323_p0, %p1320_p13 }
 0x2a9   :  { %1328 = shalt.err (!%p1325_p1)
}
 0x2aa   :  { %s1352_s20 = smov 128   ;;  %s1353_s21 = smov 8  }
 0x2ab   :  { %833 = dma.vmem_to_hbm [thread:$0]  %s828_s18, 2048, %s1551_s8, [#allocation4], %s1352_s20, %s1352_s20, %s1353_s21  }
 0x2ac   :  { %1339 = dma.done.wait [#allocation4], 2048  }
 0x2ad   :  { %1340 = vsyncadd [#allocation4], 4294965248 }
 0x2ae   :  { %837 = vsyncpa [#allocation3], 1 }
 0x2af   :  { %838 = vsyncpa [#allocation6], 1 }
 0x2b0   :  { %839 = vsyncpa [#allocation9], 1 }
 0x2b1   :  { %840 = vsyncpa [#allocation12], 1 }
 0x2b2   :  { %841 = vsyncpa [#allocation15], 1 }
 0x2b3   :  { %842 = vsyncpa [#allocation4], 1 }

</bundles_post_ra>
